<compile_context>
chip_gen: v7x
topology: tpu7x:2x2x1
jax: 0.10.0
libtpu: 0.0.40
codegen_flags: <defaults>
</compile_context>

<pallas_src>
import jax
import jax.numpy as jnp
import numpy as np
from jax import lax
from jax.experimental import pallas as pl
from jax.experimental.pallas import tpu as pltpu

# ---------------- model config (small, consistent with the module) ----------
VOCAB_SIZE = 50
EMBED_DIM = 32      # embedding_dim
OUT_DIM = 4         # output_dim
PAD_IDX = 0
N_FILTERS = 100     # conv out_channels
KH = 3              # conv kernel height

BATCH = 2
SEQ = 8
CONV_T = SEQ - KH + 1        # conv output length (= 6)

TPB = 8                      # time rows per batch block (CONV_T padded to 8)
ROWS_PAD = BATCH * TPB       # im2col rows, 8-aligned (= 16)
OUT_ROWS = 8                 # output rows (BATCH padded to one sublane tile)

NF_PAD = 128                 # filters padded to the native 128-lane width
KV_PAD = 256                 # contraction dim: KH*VOCAB_SIZE=150 padded to 2x128
W_ROWS = KV_PAD + NF_PAD + 8 # weight slab rows: G | fc weight | bias (+zero pad)


def _cnn_kernel(text_ref, w_ref, out_ref):
    """Single invocation over the whole batch (no grid).

    text_ref : SMEM (BATCH*SEQ,) int32 -- raw token ids
    w_ref    : VMEM (W_ROWS, NF_PAD) f32 weight slab:
                 rows [0:256]   G   (embedding folded into conv rows, padded)
                 rows [256:384] fc weight (transposed, padded to 128x128)
                 row  [384]     fc bias with conv bias folded in (padded)
    out_ref  : VMEM (OUT_ROWS, NF_PAD) f32 -- lane-dense padded output
    """
    col = lax.broadcasted_iota(jnp.int32, (ROWS_PAD, KV_PAD), 1)   # lane ids 0..255
    row = lax.broadcasted_iota(jnp.int32, (ROWS_PAD, KV_PAD), 0)   # sublane ids 0..15

    # In-kernel im2col one-hot: row r = b*TPB + t holds KH ones at
    # text[b, t+k] + k*VOCAB_SIZE (id ranges disjoint).  Rows t >= CONV_T stay 0.
    hit = None
    for b in range(BATCH):
        for t in range(CONV_T):
            m = col == text_ref[b * SEQ + t]                       # k = 0
            for k in range(1, KH):                                 # static unroll
                m = jnp.logical_or(
                    m, col == text_ref[b * SEQ + t + k] + k * VOCAB_SIZE)
            m = jnp.logical_and(row == (b * TPB + t), m)           # row mask is const
            hit = m if hit is None else jnp.logical_or(hit, m)
    onehot = hit.astype(jnp.float32)                               # (16, 256)

    # Embedding gather + Conv2d(1,100,(3,E)) collapse into one MXU matmul.
    conv = jnp.dot(onehot, w_ref[0:KV_PAD, :],
                   preferred_element_type=jnp.float32)             # (16, 128)

    # Mask the padded time rows (t >= CONV_T) to -inf: conv values can be
    # negative and those rows' one-hot is all-zero (conv row == 0 there).
    t_in_block = lax.broadcasted_iota(jnp.int32, (ROWS_PAD, NF_PAD), 0) & (TPB - 1)
    conv = jnp.where(t_in_block < CONV_T, conv, jnp.full_like(conv, -jnp.inf))

    # max_pool1d over the full time axis: aligned reshape + one XLU reduce.
    pooled = jnp.max(conv.reshape(BATCH, TPB, NF_PAD), axis=1)     # (BATCH, 128)
    pooled = jnp.concatenate(
        [pooled, jnp.zeros((OUT_ROWS - BATCH, NF_PAD), jnp.float32)],
        axis=0)                                                    # (8, 128)

    # fc: padded filter rows of the weight are zero, padded lanes are zero.
    wf = w_ref[KV_PAD:KV_PAD + NF_PAD, :]                          # (128, 128)
    bf = w_ref[KV_PAD + NF_PAD:KV_PAD + NF_PAD + 1, :]             # (1, 128)
    out_ref[...] = (
        jnp.dot(pooled, wf, preferred_element_type=jnp.float32) + bf
    )


def prepare_params(emb_table, conv_w, conv_b, fc_w, fc_b):
    """One-time parameter repacking into a single lane-dense weight slab.

    Folds the embedding table into the conv weight (exact: lookup is linear),
    flattens over kernel rows, pads filters 100->128 and the contraction dim
    150->256, pads the fc weight/bias to 128 lanes, folds the conv bias into
    the fc bias, and concatenates everything into one (W_ROWS, 128) buffer.
    """
    # G[k*V + v, c] = sum_e table[v, e] * conv_w[c, 0, k, e]
    g = jnp.einsum("ve,cke->kvc", emb_table, conv_w[:, 0, :, :])     # (KH, V, NF)
    g = g.reshape(KH * VOCAB_SIZE, N_FILTERS)                        # (150, 100)
    g = jnp.pad(g, ((0, KV_PAD - KH * VOCAB_SIZE), (0, NF_PAD - N_FILTERS)))

    wf = jnp.pad(fc_w.T, ((0, NF_PAD - N_FILTERS), (0, NF_PAD - OUT_DIM)))  # (128,128)

    bf_eff = fc_b + conv_b @ fc_w.T                                  # exact bias fold
    bf_eff = jnp.pad(bf_eff, (0, NF_PAD - OUT_DIM)).reshape(1, NF_PAD)

    tail = jnp.zeros((W_ROWS - KV_PAD - NF_PAD - 1, NF_PAD), jnp.float32)
    slab = jnp.concatenate([g, wf, bf_eff, tail], axis=0)            # (392, 128)
    return slab.astype(jnp.float32)


def cnn_model_forward(text, w_slab):
    """text: (BATCH, SEQ) int32 token ids.  Returns (BATCH, OUT_DIM) float32."""
    text_flat = text.reshape(BATCH * SEQ).astype(jnp.int32)          # tiny SMEM input
    out = pl.pallas_call(
        _cnn_kernel,
        out_shape=jax.ShapeDtypeStruct((OUT_ROWS, NF_PAD), jnp.float32),
        in_specs=[
            pl.BlockSpec(memory_space=pltpu.MemorySpace.SMEM),       # token ids
            pl.BlockSpec(memory_space=pltpu.MemorySpace.VMEM),       # weight slab
        ],
        out_specs=pl.BlockSpec(memory_space=pltpu.MemorySpace.VMEM),
    )(text_flat, w_slab)
    return out[:BATCH, :OUT_DIM]


def _reference_forward(text, emb_table, conv_w, conv_b, fc_w, fc_b):
    """Pure-JAX reference matching PyTorch semantics exactly."""
    embedded = emb_table[text]                               # (B, S, E)
    x = embedded[:, None, :, :]                              # (B, 1, S, E)  NCHW
    conved = jax.lax.conv_general_dilated(
        x, conv_w, window_strides=(1, 1), padding="VALID",
        dimension_numbers=("NCHW", "OIHW", "NCHW"),
    ) + conv_b[None, :, None, None]
    conved = conved[..., 0]                                  # (B, 100, S-2)
    pooled = jnp.max(conved, axis=2)                         # (B, 100)
    return pooled @ fc_w.T + fc_b                            # (B, OUT_DIM)


if __name__ == "__main__":
    key = jax.random.PRNGKey(0)
    k_emb, k_cw, k_cb, k_fw, k_fb, k_txt = jax.random.split(key, 6)

    # Deterministic synthetic parameters.
    emb_table = jax.random.normal(k_emb, (VOCAB_SIZE, EMBED_DIM), jnp.float32) * 0.1
    emb_table = emb_table.at[PAD_IDX].set(0.0)   # nn.Embedding padding_idx row = 0
    conv_w = jax.random.normal(k_cw, (N_FILTERS, 1, KH, EMBED_DIM), jnp.float32) * 0.1
    conv_b = jax.random.normal(k_cb, (N_FILTERS,), jnp.float32) * 0.1
    fc_w = jax.random.normal(k_fw, (OUT_DIM, N_FILTERS), jnp.float32) * 0.1
    fc_b = jax.random.normal(k_fb, (OUT_DIM,), jnp.float32) * 0.1

    # Example input: (batch, seq) token ids, includes some padding tokens.
    text = jax.random.randint(k_txt, (BATCH, SEQ), 0, VOCAB_SIZE, dtype=jnp.int32)
    text = text.at[0, -2:].set(PAD_IDX)

    # One-time parameter repacking (off the hot path).
    w_slab = prepare_params(emb_table, conv_w, conv_b, fc_w, fc_b)
    forward = jax.jit(cnn_model_forward)

    out = forward(text, w_slab)
    out = jax.block_until_ready(out)

    ref = _reference_forward(text, emb_table, conv_w, conv_b, fc_w, fc_b)
    assert out.shape == (BATCH, OUT_DIM)
    np.testing.assert_allclose(np.asarray(out), np.asarray(ref), rtol=1e-4, atol=1e-4)

    print("KERNEL_OK")
</pallas_src>

<mosaic_0001>
module attributes {stable_mosaic.version = 11 : i64} {
  func.func @_cnn_kernel(%arg0: memref<16xi32, #tpu.memory_space<smem>>, %arg1: memref<392x128xf32, #tpu.memory_space<vmem>>, %arg2: memref<8x128xf32, #tpu.memory_space<vmem>>) attributes {dimension_semantics = [], scalar_prefetch = 0 : i64, scratch_operands = 0 : i64, tpu.core_type = #tpu.core_type<tc>} {
    %0 = tpu.iota {dimensions = array<i32: 1>} : vector<16x256xi32>
    %1 = tpu.iota {dimensions = array<i32: 0>} : vector<16x256xi32>
    %c0 = arith.constant 0 : index
    %2 = memref.load %arg0[%c0] : memref<16xi32, #tpu.memory_space<smem>>
    %3 = vector.broadcast %2 : i32 to vector<16x256xi32>
    %4 = arith.cmpi eq, %0, %3 : vector<16x256xi32>
    %c1 = arith.constant 1 : index
    %5 = memref.load %arg0[%c1] : memref<16xi32, #tpu.memory_space<smem>>
    %c50_i32 = arith.constant 50 : i32
    %6 = arith.addi %5, %c50_i32 : i32
    %7 = vector.broadcast %6 : i32 to vector<16x256xi32>
    %8 = arith.cmpi eq, %0, %7 : vector<16x256xi32>
    %9 = arith.ori %4, %8 : vector<16x256xi1>
    %c2 = arith.constant 2 : index
    %10 = memref.load %arg0[%c2] : memref<16xi32, #tpu.memory_space<smem>>
    %c100_i32 = arith.constant 100 : i32
    %11 = arith.addi %10, %c100_i32 : i32
    %12 = vector.broadcast %11 : i32 to vector<16x256xi32>
    %13 = arith.cmpi eq, %0, %12 : vector<16x256xi32>
    %14 = arith.ori %9, %13 : vector<16x256xi1>
    %c0_i32 = arith.constant 0 : i32
    %15 = vector.broadcast %c0_i32 : i32 to vector<16x256xi32>
    %16 = arith.cmpi eq, %1, %15 : vector<16x256xi32>
    %17 = arith.andi %16, %14 : vector<16x256xi1>
    %c1_0 = arith.constant 1 : index
    %18 = memref.load %arg0[%c1_0] : memref<16xi32, #tpu.memory_space<smem>>
    %19 = vector.broadcast %18 : i32 to vector<16x256xi32>
    %20 = arith.cmpi eq, %0, %19 : vector<16x256xi32>
    %c2_1 = arith.constant 2 : index
    %21 = memref.load %arg0[%c2_1] : memref<16xi32, #tpu.memory_space<smem>>
    %c50_i32_2 = arith.constant 50 : i32
    %22 = arith.addi %21, %c50_i32_2 : i32
    %23 = vector.broadcast %22 : i32 to vector<16x256xi32>
    %24 = arith.cmpi eq, %0, %23 : vector<16x256xi32>
    %25 = arith.ori %20, %24 : vector<16x256xi1>
    %c3 = arith.constant 3 : index
    %26 = memref.load %arg0[%c3] : memref<16xi32, #tpu.memory_space<smem>>
    %c100_i32_3 = arith.constant 100 : i32
    %27 = arith.addi %26, %c100_i32_3 : i32
    %28 = vector.broadcast %27 : i32 to vector<16x256xi32>
    %29 = arith.cmpi eq, %0, %28 : vector<16x256xi32>
    %30 = arith.ori %25, %29 : vector<16x256xi1>
    %c1_i32 = arith.constant 1 : i32
    %31 = vector.broadcast %c1_i32 : i32 to vector<16x256xi32>
    %32 = arith.cmpi eq, %1, %31 : vector<16x256xi32>
    %33 = arith.andi %32, %30 : vector<16x256xi1>
    %34 = arith.ori %17, %33 : vector<16x256xi1>
    %c2_4 = arith.constant 2 : index
    %35 = memref.load %arg0[%c2_4] : memref<16xi32, #tpu.memory_space<smem>>
    %36 = vector.broadcast %35 : i32 to vector<16x256xi32>
    %37 = arith.cmpi eq, %0, %36 : vector<16x256xi32>
    %c3_5 = arith.constant 3 : index
    %38 = memref.load %arg0[%c3_5] : memref<16xi32, #tpu.memory_space<smem>>
    %c50_i32_6 = arith.constant 50 : i32
    %39 = arith.addi %38, %c50_i32_6 : i32
    %40 = vector.broadcast %39 : i32 to vector<16x256xi32>
    %41 = arith.cmpi eq, %0, %40 : vector<16x256xi32>
    %42 = arith.ori %37, %41 : vector<16x256xi1>
    %c4 = arith.constant 4 : index
    %43 = memref.load %arg0[%c4] : memref<16xi32, #tpu.memory_space<smem>>
    %c100_i32_7 = arith.constant 100 : i32
    %44 = arith.addi %43, %c100_i32_7 : i32
    %45 = vector.broadcast %44 : i32 to vector<16x256xi32>
    %46 = arith.cmpi eq, %0, %45 : vector<16x256xi32>
    %47 = arith.ori %42, %46 : vector<16x256xi1>
    %c2_i32 = arith.constant 2 : i32
    %48 = vector.broadcast %c2_i32 : i32 to vector<16x256xi32>
    %49 = arith.cmpi eq, %1, %48 : vector<16x256xi32>
    %50 = arith.andi %49, %47 : vector<16x256xi1>
    %51 = arith.ori %34, %50 : vector<16x256xi1>
    %c3_8 = arith.constant 3 : index
    %52 = memref.load %arg0[%c3_8] : memref<16xi32, #tpu.memory_space<smem>>
    %53 = vector.broadcast %52 : i32 to vector<16x256xi32>
    %54 = arith.cmpi eq, %0, %53 : vector<16x256xi32>
    %c4_9 = arith.constant 4 : index
    %55 = memref.load %arg0[%c4_9] : memref<16xi32, #tpu.memory_space<smem>>
    %c50_i32_10 = arith.constant 50 : i32
    %56 = arith.addi %55, %c50_i32_10 : i32
    %57 = vector.broadcast %56 : i32 to vector<16x256xi32>
    %58 = arith.cmpi eq, %0, %57 : vector<16x256xi32>
    %59 = arith.ori %54, %58 : vector<16x256xi1>
    %c5 = arith.constant 5 : index
    %60 = memref.load %arg0[%c5] : memref<16xi32, #tpu.memory_space<smem>>
    %c100_i32_11 = arith.constant 100 : i32
    %61 = arith.addi %60, %c100_i32_11 : i32
    %62 = vector.broadcast %61 : i32 to vector<16x256xi32>
    %63 = arith.cmpi eq, %0, %62 : vector<16x256xi32>
    %64 = arith.ori %59, %63 : vector<16x256xi1>
    %c3_i32 = arith.constant 3 : i32
    %65 = vector.broadcast %c3_i32 : i32 to vector<16x256xi32>
    %66 = arith.cmpi eq, %1, %65 : vector<16x256xi32>
    %67 = arith.andi %66, %64 : vector<16x256xi1>
    %68 = arith.ori %51, %67 : vector<16x256xi1>
    %c4_12 = arith.constant 4 : index
    %69 = memref.load %arg0[%c4_12] : memref<16xi32, #tpu.memory_space<smem>>
    %70 = vector.broadcast %69 : i32 to vector<16x256xi32>
    %71 = arith.cmpi eq, %0, %70 : vector<16x256xi32>
    %c5_13 = arith.constant 5 : index
    %72 = memref.load %arg0[%c5_13] : memref<16xi32, #tpu.memory_space<smem>>
    %c50_i32_14 = arith.constant 50 : i32
    %73 = arith.addi %72, %c50_i32_14 : i32
    %74 = vector.broadcast %73 : i32 to vector<16x256xi32>
    %75 = arith.cmpi eq, %0, %74 : vector<16x256xi32>
    %76 = arith.ori %71, %75 : vector<16x256xi1>
    %c6 = arith.constant 6 : index
    %77 = memref.load %arg0[%c6] : memref<16xi32, #tpu.memory_space<smem>>
    %c100_i32_15 = arith.constant 100 : i32
    %78 = arith.addi %77, %c100_i32_15 : i32
    %79 = vector.broadcast %78 : i32 to vector<16x256xi32>
    %80 = arith.cmpi eq, %0, %79 : vector<16x256xi32>
    %81 = arith.ori %76, %80 : vector<16x256xi1>
    %c4_i32 = arith.constant 4 : i32
    %82 = vector.broadcast %c4_i32 : i32 to vector<16x256xi32>
    %83 = arith.cmpi eq, %1, %82 : vector<16x256xi32>
    %84 = arith.andi %83, %81 : vector<16x256xi1>
    %85 = arith.ori %68, %84 : vector<16x256xi1>
    %c5_16 = arith.constant 5 : index
    %86 = memref.load %arg0[%c5_16] : memref<16xi32, #tpu.memory_space<smem>>
    %87 = vector.broadcast %86 : i32 to vector<16x256xi32>
    %88 = arith.cmpi eq, %0, %87 : vector<16x256xi32>
    %c6_17 = arith.constant 6 : index
    %89 = memref.load %arg0[%c6_17] : memref<16xi32, #tpu.memory_space<smem>>
    %c50_i32_18 = arith.constant 50 : i32
    %90 = arith.addi %89, %c50_i32_18 : i32
    %91 = vector.broadcast %90 : i32 to vector<16x256xi32>
    %92 = arith.cmpi eq, %0, %91 : vector<16x256xi32>
    %93 = arith.ori %88, %92 : vector<16x256xi1>
    %c7 = arith.constant 7 : index
    %94 = memref.load %arg0[%c7] : memref<16xi32, #tpu.memory_space<smem>>
    %c100_i32_19 = arith.constant 100 : i32
    %95 = arith.addi %94, %c100_i32_19 : i32
    %96 = vector.broadcast %95 : i32 to vector<16x256xi32>
    %97 = arith.cmpi eq, %0, %96 : vector<16x256xi32>
    %98 = arith.ori %93, %97 : vector<16x256xi1>
    %c5_i32 = arith.constant 5 : i32
    %99 = vector.broadcast %c5_i32 : i32 to vector<16x256xi32>
    %100 = arith.cmpi eq, %1, %99 : vector<16x256xi32>
    %101 = arith.andi %100, %98 : vector<16x256xi1>
    %102 = arith.ori %85, %101 : vector<16x256xi1>
    %c8 = arith.constant 8 : index
    %103 = memref.load %arg0[%c8] : memref<16xi32, #tpu.memory_space<smem>>
    %104 = vector.broadcast %103 : i32 to vector<16x256xi32>
    %105 = arith.cmpi eq, %0, %104 : vector<16x256xi32>
    %c9 = arith.constant 9 : index
    %106 = memref.load %arg0[%c9] : memref<16xi32, #tpu.memory_space<smem>>
    %c50_i32_20 = arith.constant 50 : i32
    %107 = arith.addi %106, %c50_i32_20 : i32
    %108 = vector.broadcast %107 : i32 to vector<16x256xi32>
    %109 = arith.cmpi eq, %0, %108 : vector<16x256xi32>
    %110 = arith.ori %105, %109 : vector<16x256xi1>
    %c10 = arith.constant 10 : index
    %111 = memref.load %arg0[%c10] : memref<16xi32, #tpu.memory_space<smem>>
    %c100_i32_21 = arith.constant 100 : i32
    %112 = arith.addi %111, %c100_i32_21 : i32
    %113 = vector.broadcast %112 : i32 to vector<16x256xi32>
    %114 = arith.cmpi eq, %0, %113 : vector<16x256xi32>
    %115 = arith.ori %110, %114 : vector<16x256xi1>
    %c8_i32 = arith.constant 8 : i32
    %116 = vector.broadcast %c8_i32 : i32 to vector<16x256xi32>
    %117 = arith.cmpi eq, %1, %116 : vector<16x256xi32>
    %118 = arith.andi %117, %115 : vector<16x256xi1>
    %119 = arith.ori %102, %118 : vector<16x256xi1>
    %c9_22 = arith.constant 9 : index
    %120 = memref.load %arg0[%c9_22] : memref<16xi32, #tpu.memory_space<smem>>
    %121 = vector.broadcast %120 : i32 to vector<16x256xi32>
    %122 = arith.cmpi eq, %0, %121 : vector<16x256xi32>
    %c10_23 = arith.constant 10 : index
    %123 = memref.load %arg0[%c10_23] : memref<16xi32, #tpu.memory_space<smem>>
    %c50_i32_24 = arith.constant 50 : i32
    %124 = arith.addi %123, %c50_i32_24 : i32
    %125 = vector.broadcast %124 : i32 to vector<16x256xi32>
    %126 = arith.cmpi eq, %0, %125 : vector<16x256xi32>
    %127 = arith.ori %122, %126 : vector<16x256xi1>
    %c11 = arith.constant 11 : index
    %128 = memref.load %arg0[%c11] : memref<16xi32, #tpu.memory_space<smem>>
    %c100_i32_25 = arith.constant 100 : i32
    %129 = arith.addi %128, %c100_i32_25 : i32
    %130 = vector.broadcast %129 : i32 to vector<16x256xi32>
    %131 = arith.cmpi eq, %0, %130 : vector<16x256xi32>
    %132 = arith.ori %127, %131 : vector<16x256xi1>
    %c9_i32 = arith.constant 9 : i32
    %133 = vector.broadcast %c9_i32 : i32 to vector<16x256xi32>
    %134 = arith.cmpi eq, %1, %133 : vector<16x256xi32>
    %135 = arith.andi %134, %132 : vector<16x256xi1>
    %136 = arith.ori %119, %135 : vector<16x256xi1>
    %c10_26 = arith.constant 10 : index
    %137 = memref.load %arg0[%c10_26] : memref<16xi32, #tpu.memory_space<smem>>
    %138 = vector.broadcast %137 : i32 to vector<16x256xi32>
    %139 = arith.cmpi eq, %0, %138 : vector<16x256xi32>
    %c11_27 = arith.constant 11 : index
    %140 = memref.load %arg0[%c11_27] : memref<16xi32, #tpu.memory_space<smem>>
    %c50_i32_28 = arith.constant 50 : i32
    %141 = arith.addi %140, %c50_i32_28 : i32
    %142 = vector.broadcast %141 : i32 to vector<16x256xi32>
    %143 = arith.cmpi eq, %0, %142 : vector<16x256xi32>
    %144 = arith.ori %139, %143 : vector<16x256xi1>
    %c12 = arith.constant 12 : index
    %145 = memref.load %arg0[%c12] : memref<16xi32, #tpu.memory_space<smem>>
    %c100_i32_29 = arith.constant 100 : i32
    %146 = arith.addi %145, %c100_i32_29 : i32
    %147 = vector.broadcast %146 : i32 to vector<16x256xi32>
    %148 = arith.cmpi eq, %0, %147 : vector<16x256xi32>
    %149 = arith.ori %144, %148 : vector<16x256xi1>
    %c10_i32 = arith.constant 10 : i32
    %150 = vector.broadcast %c10_i32 : i32 to vector<16x256xi32>
    %151 = arith.cmpi eq, %1, %150 : vector<16x256xi32>
    %152 = arith.andi %151, %149 : vector<16x256xi1>
    %153 = arith.ori %136, %152 : vector<16x256xi1>
    %c11_30 = arith.constant 11 : index
    %154 = memref.load %arg0[%c11_30] : memref<16xi32, #tpu.memory_space<smem>>
    %155 = vector.broadcast %154 : i32 to vector<16x256xi32>
    %156 = arith.cmpi eq, %0, %155 : vector<16x256xi32>
    %c12_31 = arith.constant 12 : index
    %157 = memref.load %arg0[%c12_31] : memref<16xi32, #tpu.memory_space<smem>>
    %c50_i32_32 = arith.constant 50 : i32
    %158 = arith.addi %157, %c50_i32_32 : i32
    %159 = vector.broadcast %158 : i32 to vector<16x256xi32>
    %160 = arith.cmpi eq, %0, %159 : vector<16x256xi32>
    %161 = arith.ori %156, %160 : vector<16x256xi1>
    %c13 = arith.constant 13 : index
    %162 = memref.load %arg0[%c13] : memref<16xi32, #tpu.memory_space<smem>>
    %c100_i32_33 = arith.constant 100 : i32
    %163 = arith.addi %162, %c100_i32_33 : i32
    %164 = vector.broadcast %163 : i32 to vector<16x256xi32>
    %165 = arith.cmpi eq, %0, %164 : vector<16x256xi32>
    %166 = arith.ori %161, %165 : vector<16x256xi1>
    %c11_i32 = arith.constant 11 : i32
    %167 = vector.broadcast %c11_i32 : i32 to vector<16x256xi32>
    %168 = arith.cmpi eq, %1, %167 : vector<16x256xi32>
    %169 = arith.andi %168, %166 : vector<16x256xi1>
    %170 = arith.ori %153, %169 : vector<16x256xi1>
    %c12_34 = arith.constant 12 : index
    %171 = memref.load %arg0[%c12_34] : memref<16xi32, #tpu.memory_space<smem>>
    %172 = vector.broadcast %171 : i32 to vector<16x256xi32>
    %173 = arith.cmpi eq, %0, %172 : vector<16x256xi32>
    %c13_35 = arith.constant 13 : index
    %174 = memref.load %arg0[%c13_35] : memref<16xi32, #tpu.memory_space<smem>>
    %c50_i32_36 = arith.constant 50 : i32
    %175 = arith.addi %174, %c50_i32_36 : i32
    %176 = vector.broadcast %175 : i32 to vector<16x256xi32>
    %177 = arith.cmpi eq, %0, %176 : vector<16x256xi32>
    %178 = arith.ori %173, %177 : vector<16x256xi1>
    %c14 = arith.constant 14 : index
    %179 = memref.load %arg0[%c14] : memref<16xi32, #tpu.memory_space<smem>>
    %c100_i32_37 = arith.constant 100 : i32
    %180 = arith.addi %179, %c100_i32_37 : i32
    %181 = vector.broadcast %180 : i32 to vector<16x256xi32>
    %182 = arith.cmpi eq, %0, %181 : vector<16x256xi32>
    %183 = arith.ori %178, %182 : vector<16x256xi1>
    %c12_i32 = arith.constant 12 : i32
    %184 = vector.broadcast %c12_i32 : i32 to vector<16x256xi32>
    %185 = arith.cmpi eq, %1, %184 : vector<16x256xi32>
    %186 = arith.andi %185, %183 : vector<16x256xi1>
    %187 = arith.ori %170, %186 : vector<16x256xi1>
    %c13_38 = arith.constant 13 : index
    %188 = memref.load %arg0[%c13_38] : memref<16xi32, #tpu.memory_space<smem>>
    %189 = vector.broadcast %188 : i32 to vector<16x256xi32>
    %190 = arith.cmpi eq, %0, %189 : vector<16x256xi32>
    %c14_39 = arith.constant 14 : index
    %191 = memref.load %arg0[%c14_39] : memref<16xi32, #tpu.memory_space<smem>>
    %c50_i32_40 = arith.constant 50 : i32
    %192 = arith.addi %191, %c50_i32_40 : i32
    %193 = vector.broadcast %192 : i32 to vector<16x256xi32>
    %194 = arith.cmpi eq, %0, %193 : vector<16x256xi32>
    %195 = arith.ori %190, %194 : vector<16x256xi1>
    %c15 = arith.constant 15 : index
    %196 = memref.load %arg0[%c15] : memref<16xi32, #tpu.memory_space<smem>>
    %c100_i32_41 = arith.constant 100 : i32
    %197 = arith.addi %196, %c100_i32_41 : i32
    %198 = vector.broadcast %197 : i32 to vector<16x256xi32>
    %199 = arith.cmpi eq, %0, %198 : vector<16x256xi32>
    %200 = arith.ori %195, %199 : vector<16x256xi1>
    %c13_i32 = arith.constant 13 : i32
    %201 = vector.broadcast %c13_i32 : i32 to vector<16x256xi32>
    %202 = arith.cmpi eq, %1, %201 : vector<16x256xi32>
    %203 = arith.andi %202, %200 : vector<16x256xi1>
    %204 = arith.ori %187, %203 : vector<16x256xi1>
    %205 = arith.extui %204 : vector<16x256xi1> to vector<16x256xi32>
    %206 = arith.sitofp %205 : vector<16x256xi32> to vector<16x256xf32>
    %c0_42 = arith.constant 0 : index
    %c0_43 = arith.constant 0 : index
    %207 = vector.load %arg1[%c0_42, %c0_43] : memref<392x128xf32, #tpu.memory_space<vmem>>, vector<256x128xf32>
    %cst = arith.constant dense<0.000000e+00> : vector<16x128xf32>
    %208 = tpu.matmul %206, %207, %cst {dimension_numbers = #tpu.dot_dimension_numbers<[1], [0], [0], [1], [0, 0, 1, 1], [], []>} : vector<16x256xf32>, vector<256x128xf32>, vector<16x128xf32> -> vector<16x128xf32>
    %209 = tpu.iota {dimensions = array<i32: 0>} : vector<16x128xi32>
    %c7_i32 = arith.constant 7 : i32
    %210 = vector.broadcast %c7_i32 : i32 to vector<16x128xi32>
    %211 = arith.andi %209, %210 : vector<16x128xi32>
    %c6_i32 = arith.constant 6 : i32
    %212 = vector.broadcast %c6_i32 : i32 to vector<16x128xi32>
    %213 = arith.cmpi slt, %211, %212 : vector<16x128xi32>
    %cst_44 = arith.constant 0xFF800000 : f32
    %214 = vector.broadcast %cst_44 : f32 to vector<16x128xf32>
    %215 = arith.select %213, %208, %214 : vector<16x128xi1>, vector<16x128xf32>
    %216 = vector.shape_cast %215 : vector<16x128xf32> to vector<2x8x128xf32>
    %cst_45 = arith.constant dense<0xFF800000> : vector<2x128xf32>
    %217 = vector.multi_reduction <maximumf>, %216, %cst_45 [1] : vector<2x8x128xf32> to vector<2x128xf32>
    %cst_46 = arith.constant 0.000000e+00 : f32
    %218 = vector.broadcast %cst_46 : f32 to vector<6x128xf32>
    %219 = tpu.concatenate %217, %218 in 0 : vector<2x128xf32>, vector<6x128xf32> -> vector<8x128xf32>
    %c256 = arith.constant 256 : index
    %c0_47 = arith.constant 0 : index
    %220 = vector.load %arg1[%c256, %c0_47] : memref<392x128xf32, #tpu.memory_space<vmem>>, vector<128x128xf32>
    %c384 = arith.constant 384 : index
    %c0_48 = arith.constant 0 : index
    %221 = vector.load %arg1[%c384, %c0_48] : memref<392x128xf32, #tpu.memory_space<vmem>>, vector<1x128xf32>
    %cst_49 = arith.constant dense<0.000000e+00> : vector<8x128xf32>
    %222 = tpu.matmul %219, %220, %cst_49 {dimension_numbers = #tpu.dot_dimension_numbers<[1], [0], [0], [1], [0, 0, 1, 1], [], []>} : vector<8x128xf32>, vector<128x128xf32>, vector<8x128xf32> -> vector<8x128xf32>
    %223 = vector.broadcast %221 : vector<1x128xf32> to vector<8x128xf32>
    %224 = arith.addf %222, %223 : vector<8x128xf32>
    %c0_50 = arith.constant 0 : index
    %c0_51 = arith.constant 0 : index
    %225 = vector.load %arg2[%c0_50, %c0_51] : memref<8x128xf32, #tpu.memory_space<vmem>>, vector<8x128xf32>
    tpu.vector_store %arg2[%c0_50, %c0_51], %224 {strides = array<i32>} : memref<8x128xf32, #tpu.memory_space<vmem>>, vector<8x128xf32>,
    return
  }
}

</mosaic_0001>

<bundles_post_ra>
// kernel: cnn_model_forward.1
= control target key start
LH: loop header
LB: loop body
LE: loop exit
PB: predicated region body
PF: predicated region fallthrough
CT: control target
= control target key end

     0   :  { %7 = vsyncpa [#allocation4], 0  ;;  %s1335_s0 = inlined_call_operand.vmem [shape: s32[16], index: 0, kind: input, shape index: {}]   ;;  %s1336_s1 = inlined_call_operand.hbm [shape: f32[392,128], index: 1, kind: input, shape index: {}]   ;;  %s1337_s2 = inlined_call_operand.vmem [shape: f32[8,128], index: 2, kind: output, shape index: {}]  }
   0x1   :  { %s15_s11 = sshll.u32 %s1335_s0, 4  ;;  %s16_s11 = int_to_ptr.vmem [resolvable:$true] %s15_s11 }
   0x2   :  { %8 = vsyncpa [#allocation3], 0  ;;  %s768_s12 = scalar_lea.vmem %s16_s11, 16  ;;  %p773_p1 = scmp.lt.s32.totalorder %s16_s11, %s16_s11 }
   0x3   :  { %p769_p0 = scmp.ne.s32.totalorder %s16_s11, %s768_s12  ;;  %p774_p2 = scmp.lt.s32.totalorder %s768_s12, %s768_s12 }
   0x5   :  { %p775_p3 = por %p774_p2, %p773_p1 }
   0x7   :  { %p776_p4 = pnand %p775_p3, %p769_p0 }
   0x9   :  { %779 = shalt.err (!%p776_p4)
}
   0xa   :  { %s806_s13 = smov [#allocation2]   ;;  %s807_s14 = smov [#allocation5]  }
   0xb   :  { %18 = dma.vmem_to_smem %s16_s11, 16, %s806_s13, [#allocation4]  }
   0xc   :  { %s24_s15 = sshll.u32 %s807_s14, 4  ;;  %s780_s18 = scalar_lea.hbm %s1336_s1, 6272  ;;  %s25_s15 = int_to_ptr.vmem [resolvable:$true] %s24_s15 }
   0xd   :  { %p781_p5 = scmp.ne.s32.totalorder %s1336_s1, %s780_s18  ;;  %p784_p6 = scmp.lt.u32.totalorder %s780_s18, %s1336_s1 }
   0xf   :  { %p786_p7 = pnand %p784_p6, %p781_p5 }
  0x11   :  { %789 = shalt.err (!%p786_p7)
}
  0x12   :  { %s790_s22 = scalar_lea.vmem %s25_s15, 6272  ;;  %p795_p9 = scmp.lt.s32.totalorder %s25_s15, %s25_s15 }
  0x13   :  { %p791_p8 = scmp.ne.s32.totalorder %s25_s15, %s790_s22  ;;  %p796_p10 = scmp.lt.s32.totalorder %s790_s22, %s790_s22 }
  0x15   :  { %p797_p11 = por %p796_p10, %p795_p9 }
  0x17   :  { %p798_p12 = pnand %p797_p11, %p791_p8 }
  0x19   :  { %801 = shalt.err (!%p798_p12)
}
  0x1a   :  { %s808_s23 = smov 128   ;;  %s809_s24 = smov 8  }
  0x1b   :  { %30 = dma.hbm_to_vmem [thread:$0]  %s1336_s1, 6272, %s25_s15, [#allocation3], %s808_s23, %s808_s23, %s809_s24  }
  0x1c   :  { %802 = dma.done.wait [#allocation4], 16  }
  0x1d   :  { %803 = vsyncadd [#allocation4], 4294967280 }
  0x1e   :  { %804 = dma.done.wait [#allocation3], 6272  }
  0x1f   :  { %805 = vsyncadd [#allocation3], 4294961024 }
  0x20   :  { %37 = sfence }
  0x21   :  { %v380_v0 = vld [vmem:[#allocation5 + $0x80] sm:$0xff]  ;;  %v381_v1 = vld [vmem:[#allocation5 + $0x88] sm:$0xff]  ;;  %v38_v3 = vlaneseq  ;;  %s843_s27 = sld [smem:[#allocation2]]  ;;  %v382_v6 = vld [vmem:[#allocation5 + $0x90] sm:$0xff]  ;;  %s845_s28 = sld [smem:[#allocation2 + $0x1]]  ;;  %v810_v14 = vmov 0.0|0.0  }
  0x22   :  { %v364_v2 = vld [vmem:[#allocation5] sm:$0xff]  ;;  %v705_v4 = vpack.c.bf16 %v381_v1, %v380_v0  ;;  %v365_v5 = vld [vmem:[#allocation5 + $0x8] sm:$0xff]  ;;  %v383_v7 = vld [vmem:[#allocation5 + $0x98] sm:$0xff]  ;;  %737 = vmatprep.subr.bf16.mxu1 %v810_v14  ;;  %s850_s1 = sld [smem:[#allocation2 + $0x2]]  ;;  %s855_s29 = sld [smem:[#allocation2 + $0x3]] }
  0x23   :  { %v707_v8 = vpack.c.bf16 %v365_v5, %v364_v2  ;;  %v709_v9 = vpack.c.bf16 %v383_v7, %v382_v6  ;;  %v366_v10 = vld [vmem:[#allocation5 + $0x10] sm:$0xff]  ;;  %v367_v11 = vld [vmem:[#allocation5 + $0x18] sm:$0xff]  ;;  %v384_v12 = vld [vmem:[#allocation5 + $0xa0] sm:$0xff]  ;;  %v847_v13 = vand.u32 127, %v38_v3  ;;  %v857_v23 = vshrl.u32 %v38_v3, 7  ;;  %s860_s30 = sld [smem:[#allocation2 + $0x4]] }
  0x24   :  { %706 = vmatprep.subr.bf16.mxu0 %v705_v4  ;;  %v385_v15 = vld [vmem:[#allocation5 + $0xa8] sm:$0xff]  ;;  %v711_v16 = vpack.c.bf16 %v367_v11, %v366_v10  ;;  %v368_v19 = vld [vmem:[#allocation5 + $0x20] sm:$0xff]  ;;  %v386_v21 = vld [vmem:[#allocation5 + $0xb0] sm:$0xff]  ;;  %s870_s4 = sld [smem:[#allocation2 + $0x5]]  ;;  %s886_s7 = sld [smem:[#allocation2 + $0x6]] }
  0x25   :  { %708 = vmatpush3.bf16.msra.mxu0 %v707_v8  ;;  %v853_v17 = vadd.s32 128, %v847_v13  ;;  %v713_v18 = vpack.c.bf16 %v385_v15, %v384_v12  ;;  %v369_v20 = vld [vmem:[#allocation5 + $0x28] sm:$0xff]  ;;  %v387_v22 = vld [vmem:[#allocation5 + $0xb8] sm:$0xff]  ;;  %v370_v30 = vld [vmem:[#allocation5 + $0x30] sm:$0xff]  ;;  %vm62_vm3 = vcmp.eq.s32.totalorder %v857_v23, 0  ;;  %vm84_vm10 = vcmp.eq.s32.totalorder %v857_v23, 1 }
  0x26   :  { %710 = vmatprep.subr.bf16.mxu0 %v709_v9  ;;  %v715_v26 = vpack.c.bf16 %v369_v20, %v368_v19  ;;  %v717_v29 = vpack.c.bf16 %v387_v22, %v386_v21  ;;  %v371_v31 = vld [vmem:[#allocation5 + $0x38] sm:$0xff]  ;;  %v388_v32 = vld [vmem:[#allocation5 + $0xc0] sm:$0xff]  ;;  %v389_v33 = vld [vmem:[#allocation5 + $0xc8] sm:$0xff]  ;;  %s925_s13 = sld [smem:[#allocation2 + $0x7]]  ;;  %v811_v19 = vmov 0.0   ;;  %s1081_s18 = sld [smem:[#allocation2 + $0x9]] }
  0x27   :  { %v45_v24 = vstv %s843_s27  ;;  %s49_s3 = sadd.s32 50, %s845_s28  ;;  %v68_v28 = vstv %s845_s28  ;;  %v719_v37 = vpack.c.bf16 %v371_v31, %v370_v30  ;;  %v721_v41 = vpack.c.bf16 %v389_v33, %v388_v32  ;;  %v372_v42 = vld [vmem:[#allocation5 + $0x40] sm:$0xff]  ;;  %v373_v43 = vld [vmem:[#allocation5 + $0x48] sm:$0xff]  ;;  %v390_v46 = vld [vmem:[#allocation5 + $0xd0] sm:$0xff]  ;;  %s1083_s19 = sld [smem:[#allocation2 + $0xa]] }
  0x28   :  { %vm865_vm0 = vcmp.eq.s32.totalorder %v853_v17, %v45_v24  ;;  %v872_v27 = vstv %s49_s3  ;;  %s56_s5 = sadd.s32 100, %s850_s1  ;;  %s71_s6 = sadd.s32 50, %s850_s1  ;;  %vm893_vm5 = vcmp.eq.s32.totalorder %v853_v17, %v68_v28  ;;  %v94_v39 = vstv %s850_s1  ;;  %v391_v47 = vld [vmem:[#allocation5 + $0xd8] sm:$0xff]  ;;  %v374_v54 = vld [vmem:[#allocation5 + $0x50] sm:$0xff]  ;;  %v392_v57 = vld [vmem:[#allocation5 + $0xe0] sm:$0xff] }
  0x29   :  { %712 = vmatpush3.bf16.msra.mxu0 %v711_v16  ;;  %vm52_vm1 = vcmp.eq.s32.totalorder %v853_v17, %v872_v27  ;;  %v881_v34 = vstv %s56_s5  ;;  %v884_v35 = vstv %s71_s6  ;;  %s78_s8 = sadd.s32 100, %s855_s29  ;;  %s97_s9 = sadd.s32 50, %s855_s29  ;;  %vm930_vm13 = vcmp.eq.s32.totalorder %v853_v17, %v94_v39  ;;  %v375_v55 = vld [vmem:[#allocation5 + $0x58] sm:$0xff]  ;;  %v393_v58 = vld [vmem:[#allocation5 + $0xe8] sm:$0xff]  ;;  %v376_v0 = vld [vmem:[#allocation5 + $0x60] sm:$0xff] }
  0x2a   :  { %714 = vmatprep.subr.bf16.mxu0 %v713_v18  ;;  %vm54_vm2 = vmor %vm865_vm0, %vm52_vm1  ;;  %vm59_vm4 = vcmp.eq.s32.totalorder %v853_v17, %v881_v34  ;;  %vm74_vm6 = vcmp.eq.s32.totalorder %v853_v17, %v884_v35  ;;  %v901_v38 = vstv %s78_s8  ;;  %v904_v40 = vstv %s97_s9  ;;  %s104_s10 = sadd.s32 100, %s860_s30  ;;  %s123_s11 = sadd.s32 50, %s860_s30  ;;  %v377_v1 = vld [vmem:[#allocation5 + $0x68] sm:$0xff]  ;;  %v394_v4 = vld [vmem:[#allocation5 + $0xf0] sm:$0xff] }
  0x2b   :  { %vm61_vm7 = vmor %vm54_vm2, %vm59_vm4  ;;  %vm81_vm9 = vcmp.eq.s32.totalorder %v853_v17, %v901_v38  ;;  %v916_v45 = vstv %s104_s10  ;;  %s130_s12 = sadd.s32 100, %s870_s4  ;;  %vm100_vm14 = vcmp.eq.s32.totalorder %v853_v17, %v904_v40  ;;  %v723_v49 = vpack.c.bf16 %v373_v43, %v372_v42  ;;  %s149_s14 = sadd.s32 50, %s870_s4  ;;  %v395_v5 = vld [vmem:[#allocation5 + $0xf8] sm:$0xff]  ;;  %v378_v12 = vld [vmem:[#allocation5 + $0x70] sm:$0xff] }
  0x2c   :  { %vm909_vm8 = vmand %vm62_vm3, %vm61_vm7  ;;  %vm107_vm0 = vcmp.eq.s32.totalorder %v853_v17, %v916_v45  ;;  %v120_v51 = vstv %s855_s29  ;;  %v945_v52 = vstv %s123_s11  ;;  %v725_v53 = vpack.c.bf16 %v391_v47, %v390_v46  ;;  %s156_s15 = sadd.s32 100, %s886_s7  ;;  %s175_s16 = sadd.s32 50, %s886_s7  ;;  %v379_v15 = vld [vmem:[#allocation5 + $0x78] sm:$0xff]  ;;  %v496_v21 = vld [vmem:[#allocation5 + $0x100] sm:$0xff] }
  0x2d   :  { %716 = vmatpush3.bf16.msra.mxu0 %v715_v26  ;;  %vm76_vm11 = vmor %vm893_vm5, %vm74_vm6  ;;  %vm1340_vm2 = vcmp.eq.s32.totalorder %v857_v23, 2  ;;  %v952_v56 = vstv %s130_s12  ;;  %vm967_vm6 = vcmp.eq.s32.totalorder %v853_v17, %v120_v51  ;;  %vm126_vm7 = vcmp.eq.s32.totalorder %v853_v17, %v945_v52  ;;  %s182_s17 = sadd.s32 100, %s925_s13  ;;  %v497_v22 = vld [vmem:[#allocation5 + $0x108] sm:$0xff]  ;;  %v498_v25 = vld [vmem:[#allocation5 + $0x110] sm:$0xff]  ;;  %s1095_s0 = sld [smem:[#allocation2 + $0x8]] }
  0x2e   :  { %718 = vmatprep.subr.bf16.mxu0 %v717_v29  ;;  %vm83_vm12 = vmor %vm76_vm11, %vm81_vm9  ;;  %v727_v60 = vpack.c.bf16 %v375_v55, %v374_v54  ;;  %vm133_vm11 = vcmp.eq.s32.totalorder %v853_v17, %v952_v56  ;;  %v146_v61 = vstv %s860_s30  ;;  %v978_v62 = vstv %s149_s14  ;;  %v499_v26 = vld [vmem:[#allocation5 + $0x118] sm:$0xff]  ;;  %v500_v30 = vld [vmem:[#allocation5 + $0x120] sm:$0xff]  ;;  %s1106_s20 = sld [smem:[#allocation2 + $0xb]]  ;;  %s203_s21 = sadd.s32 50, %s1081_s18 }
  0x2f   :  { %vm938_vm15 = vmand %vm84_vm10, %vm83_vm12  ;;  %v729_v63 = vpack.c.bf16 %v393_v58, %v392_v57  ;;  %v990_v3 = vstv %s156_s15  ;;  %v731_v7 = vpack.c.bf16 %v377_v1, %v376_v0  ;;  %v172_v9 = vstv %s870_s4  ;;  %v501_v31 = vld [vmem:[#allocation5 + $0x128] sm:$0xff]  ;;  %s1127_s22 = sld [smem:[#allocation2 + $0xc]]  ;;  %s210_s23 = sadd.s32 100, %s1083_s19  ;;  %v504_v1 = vld [vmem:[#allocation5 + $0x140] sm:$0xff] }
  0x30   :  { %vm91_vm1 = vmor %vm909_vm8, %vm938_vm15  ;;  %vm1005_vm15 = vcmp.eq.s32.totalorder %v853_v17, %v146_v61  ;;  %v1020_v10 = vstv %s175_s16  ;;  %v733_v11 = vpack.c.bf16 %v395_v5, %v394_v4  ;;  %v1027_v16 = vstv %s182_s17  ;;  %s229_s24 = sadd.s32 50, %s1083_s19  ;;  %s1159_s26 = sld [smem:[#allocation2 + $0xd]]  ;;  %v505_v2 = vld [vmem:[#allocation5 + $0x148] sm:$0xff]  ;;  %v507_v4 = vld [vmem:[#allocation5 + $0x158] sm:$0xff] }
  0x31   :  { %720 = vmatpush3.bf16.msra.mxu0 %v719_v37  ;;  %vm102_vm4 = vmor %vm930_vm13, %vm100_vm14  ;;  %vm1338_vm13 = vcmp.eq.s32.totalorder %v857_v23, 3  ;;  %v735_v18 = vpack.c.bf16 %v379_v15, %v378_v12  ;;  %v741_v29 = vpack.c.bf16 %v499_v26, %v498_v25  ;;  %v744_v33 = vpack.c.bf16 %v501_v31, %v500_v30  ;;  %s1180_s1 = sld [smem:[#allocation2 + $0xe]]  ;;  %s1204_s3 = sld [smem:[#allocation2 + $0xf]]  ;;  %v508_v6 = vld [vmem:[#allocation5 + $0x160] sm:$0xff] }
  0x32   :  { %722 = vmatprep.subr.bf16.mxu0 %v721_v41  ;;  %vm109_vm5 = vmor %vm102_vm4, %vm107_vm0  ;;  %vm152_vm0 = vcmp.eq.s32.totalorder %v853_v17, %v978_v62  ;;  %vm159_vm4 = vcmp.eq.s32.totalorder %v853_v17, %v990_v3  ;;  %v1141_v36 = vstv %s203_s21  ;;  %v1167_v41 = vstv %s229_s24  ;;  %v613_v37 = vld [vmem:[#allocation5 + $0x180] ss:$0 sm:$0xff] }
  0x33   :  { %vm113_vm9 = vmand %vm1340_vm2, %vm109_vm5  ;;  %v252_v44 = vstv %s1083_s19 }
  0x34   :  { %vm985_vm12 = vmor %vm91_vm1, %vm113_vm9  ;;  %s236_s25 = sadd.s32 100, %s1106_s20  ;;  %s255_s27 = sadd.s32 50, %s1106_s20 }
  0x35   :  { %724 = vmatpush3.bf16.msra.mxu0 %v723_v49  ;;  %vm128_vm14 = vmor %vm967_vm6, %vm126_vm7  ;;  %vm1339_vm6 = vcmp.eq.s32.totalorder %v857_v23, 4  ;;  %v1173_v42 = vstv %s236_s25  ;;  %s262_s28 = sadd.s32 100, %s1127_s22  ;;  %s281_s29 = sadd.s32 50, %s1127_s22  ;;  %v278_v49 = vstv %s1106_s20 }
  0x36   :  { %726 = vmatprep.subr.bf16.mxu0 %v725_v53  ;;  %vm135_vm8 = vmor %vm128_vm14, %vm133_vm11  ;;  %vm174_vm11 = vcmp.eq.s32.totalorder %v853_v17, %v172_v9  ;;  %vm178_vm14 = vcmp.eq.s32.totalorder %v853_v17, %v1020_v10  ;;  %v1200_v47 = vstv %s262_s28  ;;  %s288_s30 = sadd.s32 100, %s1159_s26  ;;  %v1220_v50 = vstv %s281_s29  ;;  %s307_s4 = sadd.s32 50, %s1159_s26 }
  0x37   :  { %vm1013_vm1 = vmand %vm1338_vm13, %vm135_vm8  ;;  %vm185_vm8 = vcmp.eq.s32.totalorder %v853_v17, %v1027_v16  ;;  %vm51_vm13 = vcmp.eq.s32.totalorder %v847_v13, %v872_v27  ;;  %v738_v27 = vpack.c.bf16 %v497_v22, %v496_v21  ;;  %s314_s5 = sadd.s32 100, %s1180_s1  ;;  %v308_v53 = vstv %s307_s4  ;;  %s333_s6 = sadd.s32 50, %s1180_s1 }
  0x38   :  { %vm143_vm5 = vmor %vm985_vm12, %vm1013_vm1  ;;  %v315_v55 = vstv %s314_s5  ;;  %s340_s7 = sadd.s32 100, %s1204_s3  ;;  %v334_v57 = vstv %s333_s6 }
  0x39   :  { %728 = vmatpush3.bf16.msra.mxu0 %v727_v60  ;;  %vm154_vm7 = vmor %vm1005_vm15, %vm152_vm0  ;;  %vm188_vm15 = vcmp.eq.s32.totalorder %v857_v23, 5  ;;  %739 = vmatpush3.bf16.msra.mxu1 %v738_v27  ;;  %v341_v58 = vstv %s340_s7 }
  0x3a   :  { %730 = vmatprep.subr.bf16.mxu0 %v729_v63  ;;  %vm161_vm9 = vmor %vm154_vm7, %vm159_vm4  ;;  %vm46_vm7 = vcmp.eq.s32.totalorder %v847_v13, %v45_v24  ;;  %740 = vmatprep.subr.bf16.mxu1 %v810_v14  ;;  %v503_v63 = vld [vmem:[#allocation5 + $0x138] sm:$0xff] }
  0x3b   :  { %vm165_vm12 = vmand %vm1339_vm6, %vm161_vm9  ;;  %vm58_vm6 = vcmp.eq.s32.totalorder %v847_v13, %v881_v34 }
  0x3c   :  { %vm169_vm1 = vmor %vm143_vm5, %vm165_vm12 }
  0x3d   :  { %732 = vmatpush3.bf16.msra.mxu0 %v731_v7  ;;  %vm180_vm0 = vmor %vm174_vm11, %vm178_vm14  ;;  %vm69_vm11 = vcmp.eq.s32.totalorder %v847_v13, %v68_v28  ;;  %vm73_vm14 = vcmp.eq.s32.totalorder %v847_v13, %v884_v35  ;;  %742 = vmatpush3.bf16.msra.mxu1 %v741_v29  ;;  %v199_v35 = vstv %s1095_s0  ;;  %v509_v7 = vld [vmem:[#allocation5 + $0x168] sm:$0xff] }
  0x3e   :  { %734 = vmatprep.subr.bf16.mxu0 %v733_v11  ;;  %vm187_vm4 = vmor %vm180_vm0, %vm185_vm8  ;;  %vm80_vm8 = vcmp.eq.s32.totalorder %v847_v13, %v901_v38  ;;  %vm95_vm0 = vcmp.eq.s32.totalorder %v847_v13, %v94_v39  ;;  %743 = vmatprep.subr.bf16.mxu1 %v810_v14  ;;  %v1154_v38 = vadd.s32 8, %v857_v23  ;;  %v1156_v39 = vstv %s210_s23 }
  0x3f   :  { %vm191_vm9 = vmand %vm188_vm15, %vm187_vm4  ;;  %v756_v8 = vpack.c.bf16 %v509_v7, %v508_v6 }
  0x40   :  { %vm195_vm2 = vmor %vm169_vm1, %vm191_vm9  ;;  %v472_v22 = vand.u32 7, %v1154_v38 }
  0x41   :  { %736 = vmatpush3.bf16.msra.mxu0 %v735_v18  ;;  %v610_v20 = vsel %vm195_vm2, 1.0, %v811_v19  ;;  %vm53_vm5 = vmor %vm46_vm7, %vm51_vm13  ;;  %745 = vmatpush3.bf16.msra.mxu1 %v744_v33  ;;  %v471_v18 = vand.u32 7, %v857_v23 }
  0x42   :  { %460 = vmatprep.mubr.f32.mxu0 %v610_v20  ;;  %vm60_vm12 = vmor %vm53_vm5, %vm58_vm6  ;;  %vm99_vm6 = vcmp.eq.s32.totalorder %v847_v13, %v904_v40  ;;  %vm121_vm5 = vcmp.eq.s32.totalorder %v847_v13, %v120_v51  ;;  %746 = vmatprep.subr.bf16.mxu1 %v810_v14  ;;  %v226_v40 = vstv %s1081_s18  ;;  %v1227_v51 = vstv %s288_s30 }
  0x43   :  { %vm1060_vm1 = vmand %vm62_vm3, %vm60_vm12  ;;  %vm106_vm3 = vcmp.eq.s32.totalorder %v847_v13, %v916_v45  ;;  %v1191_v45 = vstv %s255_s27 }
  0x44   :  { %vm75_vm2 = vmor %vm69_vm11, %vm73_vm14  ;;  %vm125_vm11 = vcmp.eq.s32.totalorder %v847_v13, %v945_v52  ;;  %vm1369_vm14 = vcmp.eq.s32.totalorder %v857_v23, 2  ;;  %v304_v52 = vstv %s1127_s22 }
  0x45   :  { %vm82_vm13 = vmor %vm75_vm2, %vm80_vm8  ;;  %vm132_vm8 = vcmp.eq.s32.totalorder %v847_v13, %v952_v56  ;;  %v330_v56 = vstv %s1159_s26 }
  0x46   :  { %vm1071_vm4 = vmand %vm84_vm10, %vm82_vm13 }
  0x47   :  { %vm90_vm7 = vmor %vm1060_vm1, %vm1071_vm4  ;;  %vm151_vm1 = vcmp.eq.s32.totalorder %v847_v13, %v978_v62  ;;  %vm1372_vm4 = vcmp.eq.s32.totalorder %v857_v23, 3  ;;  %v502_v62 = vld [vmem:[#allocation5 + $0x130] sm:$0xff] }
  0x48   :  { %vm101_vm9 = vmor %vm95_vm0, %vm99_vm6  ;;  %vm147_vm6 = vcmp.eq.s32.totalorder %v847_v13, %v146_v61  ;;  %v747_v0 = vpack.c.bf16 %v503_v63, %v502_v62 }
  0x49   :  { %vm108_vm10 = vmor %vm101_vm9, %vm106_vm3 }
  0x4a   :  { %vm112_vm12 = vmand %vm1369_vm14, %vm108_vm10  ;;  %vm177_vm14 = vcmp.eq.s32.totalorder %v847_v13, %v1020_v10  ;;  %748 = vmatpush3.bf16.msra.mxu1 %v747_v0  ;;  %v511_v10 = vld [vmem:[#allocation5 + $0x178] sm:$0xff] }
  0x4b   :  { %vm1102_vm2 = vmor %vm90_vm7, %vm112_vm12  ;;  %vm158_vm7 = vcmp.eq.s32.totalorder %v847_v13, %v990_v3  ;;  %vm1375_vm12 = vcmp.eq.s32.totalorder %v857_v23, 4  ;;  %749 = vmatprep.subr.bf16.mxu1 %v810_v14  ;;  %v750_v3 = vpack.c.bf16 %v505_v2, %v504_v1 }
  0x4c   :  { %vm127_vm13 = vmor %vm121_vm5, %vm125_vm11  ;;  %vm173_vm11 = vcmp.eq.s32.totalorder %v847_v13, %v172_v9  ;;  %v510_v9 = vld [vmem:[#allocation5 + $0x170] sm:$0xff] }
  0x4d   :  { %vm134_vm0 = vmor %vm127_vm13, %vm132_vm8  ;;  %vm184_vm13 = vcmp.eq.s32.totalorder %v847_v13, %v1027_v16  ;;  %v759_v11 = vpack.c.bf16 %v511_v10, %v510_v9 }
  0x4e   :  { %vm1116_vm3 = vmand %vm1372_vm4, %vm134_vm0  ;;  %vm201_vm4 = vcmp.eq.s32.totalorder %v853_v17, %v199_v35  ;;  %751 = vmatpush3.bf16.msra.mxu1 %v750_v3 }
  0x4f   :  { %vm142_vm9 = vmor %vm1102_vm2, %vm1116_vm3  ;;  %vm206_vm2 = vcmp.eq.s32.totalorder %v853_v17, %v1141_v36  ;;  %752 = vmatprep.subr.bf16.mxu1 %v810_v14 }
  0x50   :  { %vm153_vm10 = vmor %vm147_vm6, %vm151_vm1 }
  0x51   :  { %vm160_vm5 = vmor %vm153_vm10, %vm158_vm7  ;;  %vm213_vm7 = vcmp.eq.s32.totalorder %v853_v17, %v1156_v39  ;;  %vm1344_vm10 = vcmp.eq.s32.totalorder %v1154_v38, 8 }
  0x52   :  { %vm164_vm8 = vmand %vm1375_vm12, %vm160_vm5  ;;  %vm239_vm12 = vcmp.eq.s32.totalorder %v853_v17, %v1173_v42 }
  0x53   :  { %vm1149_vm0 = vmor %vm142_vm9, %vm164_vm8 }
  0x54   :  { %vm179_vm6 = vmor %vm173_vm11, %vm177_vm14  ;;  %vm232_vm11 = vcmp.eq.s32.totalorder %v853_v17, %v1167_v41 }
  0x55   :  { %vm186_vm1 = vmor %vm179_vm6, %vm184_vm13  ;;  %vm1343_vm13 = vcmp.eq.s32.totalorder %v1154_v38, 9 }
  0x56   :  { %vm190_vm3 = vmand %vm188_vm15, %vm186_vm1  ;;  %vm228_vm15 = vcmp.eq.s32.totalorder %v853_v17, %v226_v40  ;;  %vm254_vm1 = vcmp.eq.s32.totalorder %v853_v17, %v252_v44 }
  0x57   :  { %vm194_vm9 = vmor %vm1149_vm0, %vm190_vm3  ;;  %vm265_vm3 = vcmp.eq.s32.totalorder %v853_v17, %v1200_v47 }
  0x58   :  { %v609_v43 = vsel %vm194_vm9, 1.0, %v811_v19  ;;  %vm208_vm5 = vmor %vm201_vm4, %vm206_vm2  ;;  %vm258_vm4 = vcmp.eq.s32.totalorder %v853_v17, %v1191_v45  ;;  %vm1342_vm9 = vcmp.eq.s32.totalorder %v1154_v38, 10 }
  0x59   :  { %461 = vmatmul.mubr.f32.vlgmr.msra.gmra.mrb[0].mxu0 %v609_v43  ;;  %vm215_vm14 = vmor %vm208_vm5, %vm213_vm7 }
  0x5a   :  { %vm1195_vm8 = vmand %vm1344_vm10, %vm215_vm14  ;;  %vm284_vm14 = vcmp.eq.s32.totalorder %v853_v17, %v1220_v50 }
  0x5b   :  { %vm234_vm0 = vmor %vm228_vm15, %vm232_vm11  ;;  %vm280_vm11 = vcmp.eq.s32.totalorder %v853_v17, %v278_v49 }
  0x5c   :  { %vm241_vm6 = vmor %vm234_vm0, %vm239_vm12 }
  0x5d   :  { %vm1213_vm2 = vmand %vm1343_vm13, %vm241_vm6  ;;  %vm1341_vm6 = vcmp.eq.s32.totalorder %v1154_v38, 11  ;;  %vm1345_vm13 = vcmp.eq.s32.totalorder %v1154_v38, 13 }
  0x5e   :  { %vm251_vm7 = vmor %vm1195_vm8, %vm1213_vm2  ;;  %vm291_vm8 = vcmp.eq.s32.totalorder %v853_v17, %v1227_v51  ;;  %vm306_vm2 = vcmp.eq.s32.totalorder %v853_v17, %v304_v52 }
  0x5f   :  { %vm260_vm5 = vmor %vm254_vm1, %vm258_vm4 }
  0x60   :  { %vm267_vm15 = vmor %vm260_vm5, %vm265_vm3  ;;  %vm310_vm3 = vcmp.eq.s32.totalorder %v853_v17, %v308_v53 }
  0x61   :  { %vm273_vm12 = vmand %vm1342_vm9, %vm267_vm15  ;;  %vm317_vm15 = vcmp.eq.s32.totalorder %v853_v17, %v315_v55 }
  0x62   :  { %vm1241_vm0 = vmor %vm251_vm7, %vm273_vm12  ;;  %vm1346_vm12 = vcmp.eq.s32.totalorder %v1154_v38, 12 }
  0x63   :  { %vm286_vm1 = vmor %vm280_vm11, %vm284_vm14 }
  0x64   :  { %vm293_vm4 = vmor %vm286_vm1, %vm291_vm8  ;;  %vm332_vm8 = vcmp.eq.s32.totalorder %v853_v17, %v330_v56  ;;  %vm336_vm1 = vcmp.eq.s32.totalorder %v853_v17, %v334_v57 }
  0x65   :  { %vm299_vm5 = vmand %vm1341_vm6, %vm293_vm4  ;;  %vm343_vm6 = vcmp.eq.s32.totalorder %v853_v17, %v341_v58 }
  0x66   :  { %vm303_vm7 = vmor %vm1241_vm0, %vm299_vm5 }
  0x67   :  { %vm312_vm11 = vmor %vm306_vm2, %vm310_vm3  ;;  %vm200_vm2 = vcmp.eq.s32.totalorder %v847_v13, %v199_v35  ;;  %vm205_vm3 = vcmp.eq.s32.totalorder %v847_v13, %v1141_v36 }
  0x68   :  { %vm319_vm14 = vmor %vm312_vm11, %vm317_vm15  ;;  %vm212_vm15 = vcmp.eq.s32.totalorder %v847_v13, %v1156_v39 }
  0x69   :  { %vm325_vm4 = vmand %vm1346_vm12, %vm319_vm14 }
  0x6a   :  { %vm329_vm9 = vmor %vm303_vm7, %vm325_vm4 }
  0x6b   :  { %vm338_vm10 = vmor %vm332_vm8, %vm336_vm1  ;;  %vm238_vm8 = vcmp.eq.s32.totalorder %v847_v13, %v1173_v42  ;;  %vm1384_vm1 = vcmp.eq.s32.totalorder %v1154_v38, 8 }
  0x6c   :  { %vm345_vm0 = vmor %vm338_vm10, %vm343_vm6  ;;  %vm227_vm10 = vcmp.eq.s32.totalorder %v847_v13, %v226_v40  ;;  %vm231_vm6 = vcmp.eq.s32.totalorder %v847_v13, %v1167_v41 }
  0x6d   :  { %vm351_vm5 = vmand %vm1345_vm13, %vm345_vm0 }
  0x6e   :  { %vm355_vm11 = vmor %vm329_vm9, %vm351_vm5  ;;  %vm1387_vm5 = vcmp.eq.s32.totalorder %v1154_v38, 9 }
  0x6f   :  { %v612_v17 = vsel %vm355_vm11, 1.0, %v811_v19  ;;  %vm207_vm7 = vmor %vm200_vm2, %vm205_vm3  ;;  %vm253_vm2 = vcmp.eq.s32.totalorder %v847_v13, %v252_v44  ;;  %vm257_vm3 = vcmp.eq.s32.totalorder %v847_v13, %v1191_v45  ;;  %vm264_vm11 = vcmp.eq.s32.totalorder %v847_v13, %v1200_v47 }
  0x70   :  { %465 = vmatprep.mubr.f32.mxu0 %v612_v17  ;;  %vm214_vm14 = vmor %vm207_vm7, %vm212_vm15 }
  0x71   :  { %vm1282_vm4 = vmand %vm1384_vm1, %vm214_vm14 }
  0x72   :  { %vm233_vm9 = vmor %vm227_vm10, %vm231_vm6  ;;  %vm279_vm10 = vcmp.eq.s32.totalorder %v847_v13, %v278_v49  ;;  %vm283_vm6 = vcmp.eq.s32.totalorder %v847_v13, %v1220_v50 }
  0x73   :  { %vm240_vm0 = vmor %vm233_vm9, %vm238_vm8  ;;  %vm1388_vm8 = vcmp.eq.s32.totalorder %v1154_v38, 10 }
  0x74   :  { %vm246_vm15 = vmand %vm1387_vm5, %vm240_vm0  ;;  %vm290_vm0 = vcmp.eq.s32.totalorder %v847_v13, %v1227_v51 }
  0x75   :  { %vm250_vm7 = vmor %vm1282_vm4, %vm246_vm15  ;;  %vm1391_vm15 = vcmp.eq.s32.totalorder %v1154_v38, 11 }
  0x76   :  { %vm259_vm14 = vmor %vm253_vm2, %vm257_vm3  ;;  %vm305_vm2 = vcmp.eq.s32.totalorder %v847_v13, %v304_v52  ;;  %vm309_vm3 = vcmp.eq.s32.totalorder %v847_v13, %v308_v53 }
  0x77   :  { %vm266_vm1 = vmor %vm259_vm14, %vm264_vm11  ;;  %vm316_vm14 = vcmp.eq.s32.totalorder %v847_v13, %v315_v55 }
  0x78   :  { %vm272_vm9 = vmand %vm1388_vm8, %vm266_vm1 }
  0x79   :  { %vm1306_vm5 = vmor %vm250_vm7, %vm272_vm9  ;;  %vm331_vm7 = vcmp.eq.s32.totalorder %v847_v13, %v330_v56  ;;  %vm335_vm9 = vcmp.eq.s32.totalorder %v847_v13, %v334_v57 }
  0x7a   :  { %vm285_vm13 = vmor %vm279_vm10, %vm283_vm6  ;;  %vm342_vm6 = vcmp.eq.s32.totalorder %v847_v13, %v341_v58  ;;  %v506_v13 = vld [vmem:[#allocation5 + $0x150] sm:$0xff] }
  0x7b   :  { %vm292_vm4 = vmor %vm285_vm13, %vm290_vm0  ;;  %vm1392_vm13 = vcmp.eq.s32.totalorder %v1154_v38, 12  ;;  %v753_v5 = vpack.c.bf16 %v507_v4, %v506_v13 }
  0x7c   :  { %vm298_vm11 = vmand %vm1391_vm15, %vm292_vm4 }
  0x7d   :  { %vm302_vm1 = vmor %vm1306_vm5, %vm298_vm11  ;;  %vm1393_vm5 = vcmp.eq.s32.totalorder %v1154_v38, 13  ;;  %754 = vmatpush3.bf16.msra.mxu1 %v753_v5 }
  0x7e   :  { %vm311_vm8 = vmor %vm305_vm2, %vm309_vm3  ;;  %755 = vmatprep.subr.bf16.mxu1 %v810_v14  ;;  %vm473_vm3 = vcmp.lt.s32.totalorder %v471_v18, 6 }
  0x7f   :  { %vm318_vm12 = vmor %vm311_vm8, %vm316_vm14  ;;  %vm474_vm14 = vcmp.lt.s32.totalorder %v472_v22, 6  ;;  %vm494_vm8 = vcmask 1041408  }
  0x80   :  { %vm324_vm10 = vmand %vm1392_vm13, %vm318_vm12  ;;  %vm812_vm12 = vmmov 0  }
  0x81   :  { %vm328_vm0 = vmor %vm302_vm1, %vm324_vm10  ;;  %757 = vmatpush3.bf16.msra.mxu1 %v756_v8  ;;  %702 = vmatprep.mubr.msk.f32.mxu1 %vm812_vm12, %v811_v19  ;;  %vm491_vm1 = vcmask 1041409  }
  0x82   :  { %vm337_vm4 = vmor %vm331_vm7, %vm335_vm9  ;;  %758 = vmatprep.subr.bf16.mxu1 %v810_v14 }
  0x83   :  { %vm344_vm15 = vmor %vm337_vm4, %vm342_vm6 }
  0x84   :  { %vm350_vm11 = vmand %vm1393_vm5, %vm344_vm15 }
  0x85   :  { %vm354_vm2 = vmor %vm328_vm0, %vm350_vm11  ;;  %760 = vmatpush3.bf16.msra.mxu1 %v759_v11 }
  0x86   :  { %v611_v61 = vsel %vm354_vm2, 1.0, %v811_v19 }
  0x87   :  { %466 = vmatmul.mubr.f32.gmra.mrb[2].mxu0 %v611_v61 }
 0x12c   :  { %v647_v12 = vpop.f32.mrb[0].mxu0 }
 0x12d   :  { %v648_v15 = vpop.f32.mrb[1].mxu0 }
 0x12e   :  { %v649_v16 = vadd.f32 %v648_v15, %v647_v12 }
 0x130   :  { %v475_v20 = vsel %vm473_vm3, %v649_v16, -inf }
 0x131   :  { %v477_v21 = vrot.slane %v475_v20, 4 }
 0x133   :  { %v478_v24 = vmax.f32 %v475_v20, %v477_v21 }
 0x135   :  { %v479_v27 = vrot.slane %v478_v24, 2 }
 0x137   :  { %v480_v30 = vmax.f32 %v478_v24, %v479_v27 }
 0x139   :  { %v481_v32 = vrot.slane %v480_v30, 1 }
 0x13b   :  { %v482_v23 = vmax.f32 %v480_v30, %v481_v32 }
 0x15a   :  { %v650_v25 = vpop.f32.mrb[2].mxu0 }
 0x15b   :  { %v651_v14 = vpop.f32.mrb[3].mxu0 }
 0x15c   :  { %v652_v26 = vadd.f32 %v651_v14, %v650_v25 }
 0x15e   :  { %v476_v28 = vsel %vm474_vm14, %v652_v26, -inf }
 0x15f   :  { %v483_v29 = vrot.slane %v476_v28, 4 }
 0x161   :  { %v484_v19 = vmax.f32 %v476_v28, %v483_v29 }
 0x163   :  { %v485_v31 = vrot.slane %v484_v19, 2 }
 0x165   :  { %v486_v33 = vmax.f32 %v484_v19, %v485_v31 }
 0x167   :  { %v487_v34 = vrot.slane %v486_v33, 1 }
 0x169   :  { %v488_v35 = vmax.f32 %v486_v33, %v487_v34 }
 0x16b   :  { %v492_v36 = vsel %vm491_vm1, %v488_v35, %v482_v23 }
 0x16c   :  { %703 = vmatmul.mubr.msk.f32.vlgmr.msra.gmra.mrb[0].mxu1 %vm494_vm8, %v492_v36 }
 0x23f   :  { %v583_v38 = vpop.f32.mrb[0].mxu1 }
 0x240   :  { %v584_v39 = vadd.f32 %v613_v37, %v583_v38  ;;  %v704_v40 = vpop.f32.mrb[1].mxu1 }
 0x242   :  { %587 = vst [vmem:[%s1337_s2] sm:$0xff] %v584_v39 }
 0x243   :  { %592 = vsyncpa [#allocation3], 1 }
 0x244   :  { %593 = vsyncpa [#allocation4], 1 }

</bundles_post_ra>
